<compile_context>
chip_gen: v5e
topology: v5e:2x2
jax: 0.10.0
libtpu: 0.0.40
codegen_flags: <defaults>
</compile_context>

<pallas_src>
import math

import jax
import jax.numpy as jnp
import numpy as np
from jax.experimental import pallas as pl
from jax.experimental.pallas import tpu as pltpu

N_STOCKS = 112  # fixed by the module


def _stock_attention_kernel(attn_ref, w1_ref, w2_ref, bfc_ref, x_ref, o_ref):
    """One (batch, T-chunk) slab.

    attn_ref : (S, S)    precomputed softmax(weight + bias) (row j mixes stock i)
    w1_ref   : (G, G)    kron(I_{G//D}, W1^T), W1 = fc_combine.weight[:, :D]
    w2_ref   : (G, G)    kron(I_{G//D}, W2^T), W2 = fc_combine.weight[:, D:]
    bfc_ref  : (1, G)    fc_combine.bias tiled G//D times (f32)
    x_ref    : (1, S, Tt*D)  input slab, lane dim = time*feature (flattened)
    o_ref    : (1, S, Tt*D)  output slab (f32)
    """
    x = x_ref[0]                                              # (S, TD), compute dtype

    # Stock mixing: y[j, td] = sum_i attn[j, i] * x[i, td]  -> one MXU matmul.
    # Cast back to the compute dtype so the FC dots stay on the fast MXU path.
    y = jnp.dot(attn_ref[...], x, preferred_element_type=jnp.float32).astype(x.dtype)

    td = x.shape[-1]
    g = w1_ref.shape[-1]                                      # FC lane-group width
    w1 = w1_ref[...]
    w2 = w2_ref[...]
    b = bfc_ref[...]

    # fc_combine(concat([x, y], -1)) per MXU-native lane group: the same small
    # block-diagonal kron weight applies the (D x D) linear to every time step in the
    # group, so there is no in-kernel relayout and no all-zero 128x128 MXU tiles.
    # Static, 128-aligned slices; usually 1-2 unrolled iterations.
    for k in range(td // g):
        lo = k * g
        out_k = (jnp.dot(x[:, lo:lo + g], w1, preferred_element_type=jnp.float32)
                 + jnp.dot(y[:, lo:lo + g], w2, preferred_element_type=jnp.float32)
                 + b)                                         # (S, G), f32
        o_ref[0, :, lo:lo + g] = out_k.astype(o_ref.dtype)


def _pick_t_tile(B, T, D, lane_cap=2048, min_total_steps=4):
    """Pick Tt dividing T with Tt*D a multiple of 128 and <= lane_cap.

    Prefers candidates giving at least `min_total_steps` grid steps overall
    (>= 2 per TensorCore on v7x, enabling DMA/compute overlap); among those, the
    widest slab (DMA amortization).  lane_cap only bounds the streamed slab width —
    the FC kron weight width is chosen independently by _pick_fc_group.
    """
    cands = [c for c in range(1, T + 1)
             if T % c == 0 and (c * D) % 128 == 0 and c * D <= lane_cap]
    if not cands:
        # TODO(synk): pad T*D up to a multiple of 128 instead of this full-span
        # fallback (correct, but non-128 lane widths hit masked partial stores).
        return T
    good = [c for c in cands if B * (T // c) >= min_total_steps]
    return max(good) if good else min(cands)


def _pick_fc_group(TD, D, mxu_lanes=128):
    """FC lane-group width: a multiple of D (time-step aligned) and of 128 (lane
    tile) that divides TD.  Capping at the MXU tile width avoids zero-tile passes
    on v5e and keeps the kron weight O(mxu_lanes^2) independent of the slab width."""
    g = (mxu_lanes * D) // math.gcd(mxu_lanes, D)             # lcm(D, 128)
    if g <= TD and TD % g == 0:
        return g
    return TD


def stock_attention(x, weight, bias, fc_w, fc_b, *, compute_dtype=jnp.float32):
    """x: (B, n_stocks, T, dim) float32. Returns same shape (float32)."""
    B, S, T, D = x.shape
    assert S == N_STOCKS

    Tt = _pick_t_tile(B, T, D)
    assert T % Tt == 0
    TD = Tt * D
    G = _pick_fc_group(TD, D)

    # --- grid-invariant preprocessing (done once, outside the kernel) ------------
    attn = jax.nn.softmax(weight + bias[None, :], axis=-1)    # (S, S), f32
    reps = G // D
    eye_g = jnp.eye(reps, dtype=jnp.float32)
    w1t = jnp.transpose(fc_w[:, :D])                          # (D, D)
    w2t = jnp.transpose(fc_w[:, D:])                          # (D, D)
    bdw1 = jnp.kron(eye_g, w1t)                               # (G, G) block-diag
    bdw2 = jnp.kron(eye_g, w2t)                               # (G, G) block-diag
    bfc_g = jnp.tile(fc_b, reps).reshape(1, G)                # (1, G), stays f32

    # Optional bf16 fast path: cast the matmul operands only; accumulate in f32.
    attn_c = attn.astype(compute_dtype)
    bdw1_c = bdw1.astype(compute_dtype)
    bdw2_c = bdw2.astype(compute_dtype)
    # Free, contiguous reshape: lane dimension becomes T*D.
    x_flat = x.reshape(B, S, T * D).astype(compute_dtype)

    itemsize = jnp.dtype(compute_dtype).itemsize
    flops = 2 * B * S * T * D * (S + 2 * D)                   # attn-mix + FC (zero-free)
    bytes_accessed = (B * S * T * D * (itemsize + 4)          # x slab in + f32 out
                      + (S * S + 2 * G * G) * itemsize + G * 4)

    const = lambda b, t: (0, 0)
    grid_spec = pltpu.PrefetchScalarGridSpec(
        num_scalar_prefetch=0,
        grid=(B, T // Tt),
        in_specs=[
            pl.BlockSpec((S, S), const),                      # attn (VMEM-resident)
            pl.BlockSpec((G, G), const),                      # kron(I, W1^T)
            pl.BlockSpec((G, G), const),                      # kron(I, W2^T)
            pl.BlockSpec((1, G), const),                      # tiled fc bias
            pl.BlockSpec((1, S, TD), lambda b, t: (b, 0, t)),  # x slab
        ],
        out_specs=pl.BlockSpec((1, S, TD), lambda b, t: (b, 0, t)),
    )

    out_flat = pl.pallas_call(
        _stock_attention_kernel,
        out_shape=jax.ShapeDtypeStruct((B, S, T * D), jnp.float32),
        grid_spec=grid_spec,
        compiler_params=pltpu.CompilerParams(
            dimension_semantics=("parallel", "parallel")),
        cost_estimate=pl.CostEstimate(
            flops=flops, transcendentals=0, bytes_accessed=bytes_accessed),
    )(attn_c, bdw1_c, bdw2_c, bfc_g, x_flat)

    return out_flat.reshape(B, S, T, D)


def stock_attention_reference(x, weight, bias, fc_w, fc_b):
    attn = jax.nn.softmax(weight + bias[None, :], axis=-1)
    y = jnp.einsum('bi...,ji->bj...', x, attn)
    xc = jnp.concatenate([x, y], axis=-1)
    return xc @ fc_w.T + fc_b


if __name__ == "__main__":
    B, S, T, D = 2, N_STOCKS, 8, 32

    key = jax.random.PRNGKey(0)
    kx, kw, kb, kfw, kfb = jax.random.split(key, 5)

    # Deterministic synthetic parameters (module shapes: weight (S,S), bias (S,),
    # fc_combine: Linear(2D -> D) i.e. weight (D, 2D), bias (D,)).
    x = jax.random.normal(kx, (B, S, T, D), dtype=jnp.float32)
    weight = 0.1 * jax.random.normal(kw, (S, S), dtype=jnp.float32)
    bias = 0.1 * jax.random.normal(kb, (S,), dtype=jnp.float32)
    fc_w = 0.1 * jax.random.normal(kfw, (D, 2 * D), dtype=jnp.float32)
    fc_b = 0.1 * jax.random.normal(kfb, (D,), dtype=jnp.float32)

    ref = stock_attention_reference(x, weight, bias, fc_w, fc_b)

    # Default f32 path: exact-ish.
    out = jax.block_until_ready(stock_attention(x, weight, bias, fc_w, fc_b))
    np.testing.assert_allclose(np.asarray(out), np.asarray(ref), atol=2e-5, rtol=2e-5)

    # bf16-operand fast path (halves the per-step slab DMA, native MXU path on
    # v6e/v7x); f32 accumulation, so only input-rounding error -> loose tolerance.
    out_bf16 = jax.block_until_ready(
        stock_attention(x, weight, bias, fc_w, fc_b, compute_dtype=jnp.bfloat16))
    np.testing.assert_allclose(np.asarray(out_bf16), np.asarray(ref),
                               atol=5e-2, rtol=5e-2)

    print("KERNEL_OK")
</pallas_src>

<mosaic_0001>
module attributes {stable_mosaic.version = 11 : i64} {
  func.func @_stock_attention_kernel(%arg0: i32, %arg1: i32, %arg2: memref<112x112xf32, #tpu.memory_space<vmem>>, %arg3: memref<128x128xf32, #tpu.memory_space<vmem>>, %arg4: memref<128x128xf32, #tpu.memory_space<vmem>>, %arg5: memref<1x128xf32, #tpu.memory_space<vmem>>, %arg6: memref<1x112x128xf32, #tpu.memory_space<vmem>>, %arg7: memref<1x112x128xf32, #tpu.memory_space<vmem>>) attributes {dimension_semantics = [#tpu.dimension_semantics<parallel>, #tpu.dimension_semantics<parallel>], iteration_bounds = array<i64: 2, 2>, scalar_prefetch = 0 : i64, scratch_operands = 0 : i64, tpu.core_type = #tpu.core_type<tc>, window_params = [{pipeline_mode = #tpu.pipeline_mode<synchronous>, transform_indices = @transform_0, window_bounds = array<i64: 112, 112>}, {pipeline_mode = #tpu.pipeline_mode<synchronous>, transform_indices = @transform_1, window_bounds = array<i64: 128, 128>}, {pipeline_mode = #tpu.pipeline_mode<synchronous>, transform_indices = @transform_2, window_bounds = array<i64: 128, 128>}, {pipeline_mode = #tpu.pipeline_mode<synchronous>, transform_indices = @transform_3, window_bounds = array<i64: 1, 128>}, {transform_indices = @transform_4, window_bounds = array<i64: 1, 112, 128>}, {transform_indices = @transform_5, window_bounds = array<i64: 1, 112, 128>}]} {
    %c0 = arith.constant 0 : index
    %c0_0 = arith.constant 0 : index
    %c0_1 = arith.constant 0 : index
    %0 = vector.load %arg6[%c0, %c0_0, %c0_1] : memref<1x112x128xf32, #tpu.memory_space<vmem>>, vector<1x112x128xf32>
    %1 = vector.shape_cast %0 : vector<1x112x128xf32> to vector<112x128xf32>
    %c0_2 = arith.constant 0 : index
    %c0_3 = arith.constant 0 : index
    %2 = vector.load %arg2[%c0_2, %c0_3] : memref<112x112xf32, #tpu.memory_space<vmem>>, vector<112x112xf32>
    %cst = arith.constant dense<0.000000e+00> : vector<112x128xf32>
    %3 = tpu.matmul %2, %1, %cst {dimension_numbers = #tpu.dot_dimension_numbers<[1], [0], [0], [1], [0, 0, 1, 1], [], []>} : vector<112x112xf32>, vector<112x128xf32>, vector<112x128xf32> -> vector<112x128xf32>
    %c0_4 = arith.constant 0 : index
    %c0_5 = arith.constant 0 : index
    %4 = vector.load %arg3[%c0_4, %c0_5] : memref<128x128xf32, #tpu.memory_space<vmem>>, vector<128x128xf32>
    %c0_6 = arith.constant 0 : index
    %c0_7 = arith.constant 0 : index
    %5 = vector.load %arg4[%c0_6, %c0_7] : memref<128x128xf32, #tpu.memory_space<vmem>>, vector<128x128xf32>
    %c0_8 = arith.constant 0 : index
    %c0_9 = arith.constant 0 : index
    %6 = vector.load %arg5[%c0_8, %c0_9] : memref<1x128xf32, #tpu.memory_space<vmem>>, vector<1x128xf32>
    %cst_10 = arith.constant dense<0.000000e+00> : vector<112x128xf32>
    %7 = tpu.matmul %1, %4, %cst_10 {dimension_numbers = #tpu.dot_dimension_numbers<[1], [0], [0], [1], [0, 0, 1, 1], [], []>} : vector<112x128xf32>, vector<128x128xf32>, vector<112x128xf32> -> vector<112x128xf32>
    %cst_11 = arith.constant dense<0.000000e+00> : vector<112x128xf32>
    %8 = tpu.matmul %3, %5, %cst_11 {dimension_numbers = #tpu.dot_dimension_numbers<[1], [0], [0], [1], [0, 0, 1, 1], [], []>} : vector<112x128xf32>, vector<128x128xf32>, vector<112x128xf32> -> vector<112x128xf32>
    %9 = arith.addf %7, %8 : vector<112x128xf32>
    %10 = vector.broadcast %6 : vector<1x128xf32> to vector<112x128xf32>
    %11 = arith.addf %9, %10 : vector<112x128xf32>
    %c0_12 = arith.constant 0 : index
    %c0_13 = arith.constant 0 : index
    %c0_14 = arith.constant 0 : index
    %12 = vector.load %arg7[%c0_12, %c0_13, %c0_14] : memref<1x112x128xf32, #tpu.memory_space<vmem>>, vector<1x112x128xf32>
    %13 = vector.shape_cast %12 : vector<1x112x128xf32> to vector<112x128xf32>
    %14 = vector.shape_cast %11 : vector<112x128xf32> to vector<1x112x128xf32>
    tpu.vector_store %arg7[%c0_12, %c0_13, %c0_14], %14 {strides = array<i32>} : memref<1x112x128xf32, #tpu.memory_space<vmem>>, vector<1x112x128xf32>,
    return
  }
  func.func @transform_0(%arg0: i32, %arg1: i32) -> (i32, i32) {
    %c0_i32 = arith.constant 0 : i32
    %c0_i32_0 = arith.constant 0 : i32
    %c0_i32_1 = arith.constant 0 : i32
    return %c0_i32, %c0_i32_0 : i32, i32
  }
  func.func @transform_1(%arg0: i32, %arg1: i32) -> (i32, i32) {
    %c0_i32 = arith.constant 0 : i32
    %c0_i32_0 = arith.constant 0 : i32
    %c0_i32_1 = arith.constant 0 : i32
    return %c0_i32, %c0_i32_0 : i32, i32
  }
  func.func @transform_2(%arg0: i32, %arg1: i32) -> (i32, i32) {
    %c0_i32 = arith.constant 0 : i32
    %c0_i32_0 = arith.constant 0 : i32
    %c0_i32_1 = arith.constant 0 : i32
    return %c0_i32, %c0_i32_0 : i32, i32
  }
  func.func @transform_3(%arg0: i32, %arg1: i32) -> (i32, i32) {
    %c0_i32 = arith.constant 0 : i32
    %c0_i32_0 = arith.constant 0 : i32
    %c0_i32_1 = arith.constant 0 : i32
    return %c0_i32, %c0_i32_0 : i32, i32
  }
  func.func @transform_4(%arg0: i32, %arg1: i32) -> (i32, i32, i32) {
    %c0_i32 = arith.constant 0 : i32
    %c0_i32_0 = arith.constant 0 : i32
    return %arg0, %c0_i32, %arg1 : i32, i32, i32
  }
  func.func @transform_5(%arg0: i32, %arg1: i32) -> (i32, i32, i32) {
    %c0_i32 = arith.constant 0 : i32
    %c0_i32_0 = arith.constant 0 : i32
    return %arg0, %c0_i32, %arg1 : i32, i32, i32
  }
}

</mosaic_0001>

<bundles_post_ra>
// kernel: tpu_custom_call.1
= control target key start
LH: loop header
LB: loop body
LE: loop exit
PB: predicated region body
PF: predicated region fallthrough
CT: control target
= control target key end

     0   :  { %s1566_s0 = inlined_call_operand.hbm [shape: f32[112,112], index: 0, kind: input, shape index: {}]   ;;  %s1567_s1 = inlined_call_operand.hbm [shape: f32[128,128], index: 1, kind: input, shape index: {}]   ;;  %s1568_s2 = inlined_call_operand.hbm [shape: f32[128,128], index: 2, kind: input, shape index: {}]   ;;  %s1569_s3 = inlined_call_operand.vmem [shape: f32[1,128], index: 3, kind: input, shape index: {}]   ;;  %s1570_s4 = inlined_call_operand.hbm [shape: f32[2,112,256], index: 4, kind: input, shape index: {}]   ;;  %s1571_s5 = inlined_call_operand.hbm [shape: f32[2,112,256], index: 5, kind: output, shape index: {}]  }
   0x1   :  { %1580 = sst [smem:[#allocation20_spill]] %s1566_s0 }
   0x2   :  { %1581 = sst [smem:[#allocation21_spill]] %s1567_s1 }
   0x3   :  { %1582 = sst [smem:[#allocation22_spill]] %s1568_s2 }
   0x4   :  { %10 = vsyncpa [#allocation3], 0 }
   0x5   :  { %11 = vsyncpa [#allocation6], 0 }
   0x6   :  { %12 = vsyncpa [#allocation9], 0 }
   0x7   :  { %14 = vsyncpa [#allocation9 + $0x1], 0 }
   0x8   :  { %15 = vsyncpa [#allocation4], 0 }
   0x9   :  { %17 = vsyncpa [#allocation4 + $0x1], 0  ;;  %s1208_s18 = smov 0   ;;  %s1210_s19 = smov 0  }
   0xa   :  { %s1212_s20 = smov 0   ;;  %s1214_s21 = smov 0  }
   0xb   :  { %s1216_s22 = smov 0   ;;  %s1218_s23 = smov 0  }
   0xc   :  { %s1220_s24 = smov 0   ;;  %s1222_s25 = smov 0  }
   0xd LB: > { %1583 = sst [smem:[#allocation15_spill]] %s1139_s18  ;;  %s760_s26 = sadd.s32 4294967295, %s1167_s25   ;;  %s1167_s25 = sphi %s1222_s25, %s23_s25   ;;  %s1163_s24 = sphi %s1220_s24, %s1612_s24   ;;  %s1159_s23 = sphi %s1218_s23, %s1611_s23   ;;  %s1155_s22 = sphi %s1216_s22, %s1610_s22   ;;  %s1151_s21 = sphi %s1214_s21, %s1609_s21   ;;  %s1147_s20 = sphi %s1212_s20, %s1608_s20   ;;  %s1143_s19 = sphi %s1210_s19, %s1607_s19   ;;  %s1139_s18 = sphi %s1208_s18, %s1606_s18  }
   0xe   : > { %s761_s27 = sadd.s32 4294967294, %s1167_s25   ;;  %p141_p0 = scmp.ne.s32.totalorder %s1143_s19, %s1139_s18 }
   0xf   : > { %p1252_p1 = scmp.eq.s32.totalorder %s760_s26, 0  ;;  %p1256_p2 = scmp.eq.s32.totalorder %s760_s26, 3 }
  0x10   : > { %p173_p3 = scmp.eq.s32.totalorder %s761_s27, 3  ;;  %p762_p5 = scmp.ge.s32.totalorder %s1167_s25, 1 }
  0x11   : > { %p1262_p4 = por %p1252_p1, %p141_p0  ;;  %p180_p7 = scmp.lt.s32.totalorder %s1167_s25, 5 }
  0x12   : > { %p1267_p6 = por %p173_p3, %p141_p0  ;;  %s1590_s1 = sld [smem:[#allocation21_spill]] }
  0x13   : > { %p1272_p8 = pnand %p762_p5, %p180_p7  ;;  %s1169_s11 = smov [#allocation5]  }
  0x14   : > { %s1587_s6 = scalar_select %p1267_p6, 1, 0 }
  0x15   : > { %p841_p9 = pneg %p1272_p8  ;;  %s207_s12 = sshll.u32 %s1169_s11, 4  ;;  %s208_s12 = int_to_ptr.vmem [resolvable:$true] %s207_s12 }
  0x16   : > { %1588 = sst [smem:[#allocation16_spill]] %s1587_s6  ;;  %s1572_s14 = smov 128  }
  0x17   : > { %p1283_p10 = pnand %p841_p9, %p1252_p1  ;;  %s1573_s15 = smov 8  }
  0x18   : > { %s205_s10 = sshll.u32 %s1590_s1, 4  ;;  %s1592_s0 = sld [smem:[#allocation20_spill]]  ;;  %s206_s10 = int_to_ptr.hbm [resolvable:$true] %s205_s10 }
  0x19   : > { %847 = dma.hbm_to_vmem [thread:$0]  (!%p1283_p10), %s206_s10, 2048, %s208_s12, [#allocation6], %s1572_s14, %s1572_s14, %s1573_s15  }
  0x1a   : > { %s1172_s27 = smov [#allocation2]   ;;  %s1593_s2 = sld [smem:[#allocation22_spill]] }
  0x1b   : > { %s193_s8 = sshll.u32 %s1172_s27, 4  ;;  %s1173_s10 = smov [#allocation7]   ;;  %s194_s8 = int_to_ptr.vmem [resolvable:$true] %s193_s8 }
  0x1c   : > { %s221_s12 = sshll.u32 %s1173_s10, 4  ;;  %s32_s16 = sadd.s32 1, %s1159_s23  ;;  %s222_s12 = int_to_ptr.vmem [resolvable:$true] %s221_s12 }
  0x1d   : > { %p33_p11 = scmp.ge.s32.totalorder %s32_s16, 2  ;;  %s35_s17 = sadd.s32 1, %s1163_s24 }
  0x1e   : > { %s191_s26 = sshll.u32 %s1592_s0, 4  ;;  %s128_s27 = sadd.s32 1, %s1147_s20  ;;  %s192_s26 = int_to_ptr.hbm [resolvable:$true] %s191_s26 }
  0x1f   : > { %844 = dma.hbm_to_vmem [thread:$0]  (!%p1283_p10), %s192_s26, 1792, %s194_s8, [#allocation3], %s1572_s14, %s1572_s14, %s1573_s15  }
  0x20   : > { %s219_s1 = sshll.u32 %s1593_s2, 4  ;;  %p135_p12 = scmp.ne.s32.totalorder %s1147_s20, %s1143_s19  ;;  %s220_s1 = int_to_ptr.hbm [resolvable:$true] %s219_s1 }
  0x21   : > { %850 = dma.hbm_to_vmem [thread:$0]  (!%p1283_p10), %s220_s1, 2048, %s222_s12, [#allocation6], %s1572_s14, %s1572_s14, %s1573_s15  }
  0x22   : > { %s1614_s16 = smov (%p33_p11, %s32_s16), 0  ;;  %s1616_s17 = smov (!%p33_p11, %s35_s17), %s1163_s24 }
  0x23   : > { %1594 = sst [smem:[#allocation17_spill]] %s1614_s16  ;;  %s124_s26 = ssub.s32 %s1159_s23, %s1614_s16 }
  0x24   : > { %p136_p13 = scmp.eq.s32.totalorder %s1167_s25, 0  ;;  %p37_p0 = scmp.ge.s32.totalorder %s1616_s17, 2 }
  0x25   : > { %p1321_p3 = por %p1256_p2, %p135_p12  ;;  %p862_p7 = scmp.lt.s32.totalorder %s1167_s25, 4 }
  0x26   : > { %p1325_p5 = por %p136_p13, %p135_p12  ;;  %s1618_s17 = smov (%p37_p0, %s1616_s17), 0 }
  0x27   : > { %s1595_s13 = scalar_select %p1321_p3, 1, 0 }
  0x28   : > { %1598 = sst [smem:[#allocation19_spill]] %s1618_s17  ;;  %s238_s8 = sand.u32 1, %s1147_s20  }
  0x29   : > { %1596 = sst [smem:[#allocation18_spill]] %s1595_s13  ;;  %s822_s9 = smul.u32 28, %s1163_s24 }
  0x2a   : > { %s123_s11 = ssub.s32 %s1163_s24, %s1618_s17  ;;  %s821_s12 = smul.u32 112, %s238_s8 }
  0x2b   : > { %s125_s10 = sor.u32 %s124_s26, %s123_s11  ;;  %s246_s29 = sadd.s32 %s1159_s23, %s822_s9 }
  0x2c   : > { %p126_p9 = scmp.eq.s32.totalorder %s125_s10, 0  ;;  %s767_s14 = sshll.u32 %s246_s29, 3 }
  0x2d   : > { %s248_s16 = scalar_lea.hbm %s1570_s4, %s767_s14  ;;  %s242_s6 = scalar_lea.vmem [#allocation8], %s821_s12 }
  0x2e   : > { %s1338_s15 = scalar_select %p126_p9, %s1147_s20, %s128_s27  }
  0x2f   : > { %s251_s18 = sshll.u32 %s242_s6, 4  ;;  %s249_s13 = sshll.u32 %s248_s16, 4  ;;  %s252_s18 = int_to_ptr.vmem [resolvable:$true] %s251_s18  ;;  %s250_s13 = int_to_ptr.hbm [resolvable:$true] %s249_s13 }
  0x30   : > { %p852_p2 = pnand %p862_p7, %p1325_p5  ;;  %s239_s17 = scalar_lea.sflag [#allocation9], %s238_s8 }
  0x31   : > { %s1174_s26 = smov 256   ;;  %s1599_s11 = smov 8  }
  0x32   : > { %s1600_s10 = smov 128   ;;  %263 = sbr.rel (%p1272_p8) target bundleno = 486 (0x1e6), region = 40 }
  0x33   : > { %854 = dma.hbm_to_vmem [thread:$0]  (!%p852_p2), %s250_s13, 1792, %s252_s18, %s239_s17, %s1174_s26, %s1600_s10, %s1599_s11  }
  0x37   : > { %1122 = dma.done.wait (%p1252_p1), [#allocation3], 1792  }
  0x38   : > { %1124 = vsyncadd (%p1252_p1), [#allocation3], 4294965504 }
  0x39   : > { %1126 = dma.done.wait (%p1252_p1), [#allocation6], 4096  }
  0x3a   : > { %1128 = vsyncadd (%p1252_p1), [#allocation6], 4294963200  ;;  %s1360_s0 = sand.u32 1, %s1143_s19  }
  0x3b   : > { %s823_s2 = smul.u32 112, %s1360_s0  ;;  %s281_s18 = scalar_lea.sflag [#allocation9], %s1360_s0 }
  0x3d   : > { %s284_s6 = scalar_lea.vmem [#allocation8], %s823_s2 }
  0x3e   : > { %1130 = dma.done.wait (%p1262_p4), %s281_s18, 1792  }
  0x3f   : > { %1132 = vsyncadd (%p1262_p4), %s281_s18, 4294965504  ;;  %v1370_v0 = vld [vmem:[%s284_s6 + $0x68] sm:$0xff]  ;;  %v1372_v1 = vld [vmem:[%s284_s6 + $0x60] sm:$0xff]  ;;  %vm340_vm0 = vcmask 916480   ;;  %s1492_s7 = scalar_lea.vmem [#allocation10], %s823_s2  ;;  %s824_s14 = smul.u32 28, %s1155_s22 }
  0x40   : > { %385 = vmatpush.msra.mxu0 %v1370_v0  ;;  %v1375_v2 = vld [vmem:[%s284_s6 + $0x58] sm:$0xff]  ;;  %v1378_v3 = vld [vmem:[%s284_s6 + $0x50] sm:$0xff]  ;;  %v1381_v4 = vld [vmem:[%s284_s6 + $0x48] sm:$0xff]  ;;  %s638_s9 = sshll.u32 %s1492_s7, 4  ;;  %s1081_s10 = scalar_lea.hbm %s1571_s5, 448  ;;  %s639_s9 = int_to_ptr.vmem [resolvable:$true] %s638_s9 }
  0x41   : > { %v1384_v5 = vld [vmem:[%s284_s6 + $0x40] sm:$0xff]  ;;  %v1387_v6 = vld [vmem:[%s284_s6 + $0x38] sm:$0xff]  ;;  %v1390_v7 = vld [vmem:[%s284_s6 + $0x30] sm:$0xff]  ;;  %s635_s16 = sadd.s32 %s1151_s21, %s824_s14  ;;  %s625_s21 = scalar_lea.sflag [#allocation4], %s1360_s0 }
  0x42   : > { %386 = vmatpush.msra.mxu0 %v1372_v1  ;;  %v1393_v8 = vld [vmem:[%s284_s6 + $0x28] sm:$0xff]  ;;  %v1396_v9 = vld [vmem:[%s284_s6 + $0x20] sm:$0xff]  ;;  %v1399_v10 = vld [vmem:[%s284_s6 + $0x18] sm:$0xff]  ;;  %s786_s17 = sshll.u32 %s635_s16, 3 }
  0x43   : > { %v1402_v11 = vld [vmem:[%s284_s6 + $0x10] sm:$0xff]  ;;  %v1405_v12 = vld [vmem:[%s284_s6 + $0x8] sm:$0xff]  ;;  %v1408_v13 = vld [vmem:[%s284_s6] sm:$0xff]  ;;  %s637_s8 = scalar_lea.hbm %s1571_s5, %s786_s17 }
  0x44   : > { %387 = vmatpush.msra.mxu0 %v1375_v2  ;;  %v326_v14 = vld [vmem:[#allocation2] sm:$0xff]  ;;  %v327_v15 = vld [vmem:[#allocation2 + $0x8] sm:$0xff]  ;;  %v328_v16 = vld [vmem:[#allocation2 + $0x10] sm:$0xff]  ;;  %s640_s12 = sshll.u32 %s637_s8, 4  ;;  %s641_s12 = int_to_ptr.hbm [resolvable:$true] %s640_s12 }
  0x45   : > { %v329_v17 = vld [vmem:[#allocation2 + $0x18] sm:$0xff]  ;;  %v330_v18 = vld [vmem:[#allocation2 + $0x20] sm:$0xff]  ;;  %v331_v19 = vld [vmem:[#allocation2 + $0x28] sm:$0xff]  ;;  %s1075_s22 = sshra.s32 %s641_s12, 4  ;;  %s1076_s22 = int_to_ptr.hbm [resolvable:$true] %s1075_s22 }
  0x46   : > { %388 = vmatpush.msra.mxu0 %v1378_v3  ;;  %v332_v20 = vld [vmem:[#allocation2 + $0x30] sm:$0xff]  ;;  %v333_v21 = vld [vmem:[#allocation2 + $0x38] sm:$0xff]  ;;  %v1420_v22 = vld [vmem:[#allocation5 + $0x78] sm:$0xff]  ;;  %s1077_s29 = scalar_lea.hbm %s1076_s22, 112  ;;  %p1082_p10 = scmp.lt.s32.totalorder %s1076_s22, %s1571_s5 }
  0x47   : > { %v1422_v23 = vld [vmem:[#allocation5 + $0x70] sm:$0xff]  ;;  %534 = vmatpush.msra.mxu2 %v1420_v22  ;;  %v473_v24 = vld [vmem:[#allocation7 + $0x78] sm:$0xff]  ;;  %v1425_v25 = vld [vmem:[#allocation5 + $0x68] sm:$0xff]  ;;  %p1078_p1 = scmp.ne.s32.totalorder %s1076_s22, %s1077_s29  ;;  %p1083_p11 = scmp.lt.s32.totalorder %s1081_s10, %s1077_s29 }
  0x48   : > { %389 = vmatpush.msra.mxu0 %v1381_v4  ;;  %475 = vmatpush.msra.mxu1 %v473_v24  ;;  %v1428_v26 = vld [vmem:[#allocation5 + $0x60] sm:$0xff]  ;;  %v334_v27 = vld [vmem:[#allocation2 + $0x40] sm:$0xff]  ;;  %v1433_v29 = vld [vmem:[#allocation5 + $0x58] sm:$0xff] }
  0x49   : > { %789 = vmatpush.msra.mxu3 %v473_v24  ;;  %535 = vmatpush.msra.mxu2 %v1422_v23  ;;  %v472_v28 = vld [vmem:[#allocation7 + $0x70] sm:$0xff]  ;;  %v471_v30 = vld [vmem:[#allocation7 + $0x68] sm:$0xff]  ;;  %v470_v32 = vld [vmem:[#allocation7 + $0x60] sm:$0xff]  ;;  %p1079_p4 = pnand %p1078_p1, %p1321_p3  ;;  %p1084_p12 = por %p1083_p11, %p1082_p10 }
  0x4a   : > { %390 = vmatpush.msra.mxu0 %v1384_v5  ;;  %476 = vmatpush.msra.mxu1 %v472_v28  ;;  %v1436_v31 = vld [vmem:[#allocation5 + $0x50] sm:$0xff]  ;;  %v1438_v33 = vld [vmem:[#allocation5 + $0x48] sm:$0xff]  ;;  %v469_v34 = vld [vmem:[#allocation7 + $0x58] sm:$0xff] }
  0x4b   : > { %536 = vmatpush.msra.mxu2 %v1425_v25  ;;  %790 = vmatpush.msra.mxu3 %v472_v28  ;;  %v1441_v35 = vld [vmem:[#allocation5 + $0x40] sm:$0xff]  ;;  %v335_v36 = vld [vmem:[#allocation2 + $0x48] sm:$0xff]  ;;  %v468_v37 = vld [vmem:[#allocation7 + $0x50] sm:$0xff]  ;;  %p1080_p8 = pneg %p1079_p4 }
  0x4c   : > { %391 = vmatpush.msra.mxu0 %v1387_v6  ;;  %477 = vmatpush.msra.mxu1 %v471_v30  ;;  %v1446_v38 = vld [vmem:[#allocation5 + $0x38] sm:$0xff]  ;;  %v467_v39 = vld [vmem:[#allocation7 + $0x48] sm:$0xff]  ;;  %v1449_v40 = vld [vmem:[#allocation5 + $0x30] sm:$0xff] }
  0x4d   : > { %537 = vmatpush.msra.mxu2 %v1428_v26  ;;  %791 = vmatpush.msra.mxu3 %v471_v30  ;;  %v466_v41 = vld [vmem:[#allocation7 + $0x40] sm:$0xff]  ;;  %v1451_v42 = vld [vmem:[#allocation5 + $0x28] sm:$0xff]  ;;  %v465_v43 = vld [vmem:[#allocation7 + $0x38] sm:$0xff]  ;;  %p1085_p13 = pnand %p1084_p12, %p1080_p8 }
  0x4e   : > { %392 = vmatpush.msra.mxu0 %v1390_v7  ;;  %478 = vmatpush.msra.mxu1 %v470_v32  ;;  %v446_v44 = vld [vmem:[#allocation5 + $0x20] sm:$0xff]  ;;  %v464_v46 = vld [vmem:[#allocation7 + $0x30] sm:$0xff]  ;;  %v445_v47 = vld [vmem:[#allocation5 + $0x18] sm:$0xff] }
  0x4f   : > { %538 = vmatpush.msra.mxu2 %v1433_v29  ;;  %792 = vmatpush.msra.mxu3 %v470_v32  ;;  %v336_v45 = vld [vmem:[#allocation2 + $0x50] sm:$0xff]  ;;  %v463_v48 = vld [vmem:[#allocation7 + $0x28] sm:$0xff]  ;;  %v444_v49 = vld [vmem:[#allocation5 + $0x10] sm:$0xff] }
  0x50   : > { %393 = vmatpush.msra.mxu0 %v1393_v8  ;;  %479 = vmatpush.msra.mxu1 %v469_v34  ;;  %v462_v50 = vld [vmem:[#allocation7 + $0x20] sm:$0xff]  ;;  %v443_v51 = vld [vmem:[#allocation5 + $0x8] sm:$0xff]  ;;  %v461_v52 = vld [vmem:[#allocation7 + $0x18] sm:$0xff] }
  0x51   : > { %539 = vmatpush.msra.mxu2 %v1436_v31  ;;  %793 = vmatpush.msra.mxu3 %v469_v34  ;;  %v442_v53 = vld [vmem:[#allocation5] sm:$0xff]  ;;  %v337_v54 = vld [vmem:[#allocation2 + $0x58] sm:$0xff]  ;;  %v460_v55 = vld [vmem:[#allocation7 + $0x10] sm:$0xff] }
  0x52   : > { %394 = vmatpush.msra.mxu0 %v1396_v9  ;;  %480 = vmatpush.msra.mxu1 %v468_v37  ;;  %v459_v56 = vld [vmem:[#allocation7 + $0x8] sm:$0xff]  ;;  %v458_v57 = vld [vmem:[#allocation7] sm:$0xff]  ;;  %v338_v58 = vld [vmem:[#allocation2 + $0x60] sm:$0xff] }
  0x53   : > { %540 = vmatpush.msra.mxu2 %v1438_v33  ;;  %794 = vmatpush.msra.mxu3 %v468_v37  ;;  %v339_v59 = vld [vmem:[#allocation2 + $0x68] sm:$0xff] }
  0x54   : > { %395 = vmatpush.msra.mxu0 %v1399_v10  ;;  %481 = vmatpush.msra.mxu1 %v467_v39 }
  0x55   : > { %541 = vmatpush.msra.mxu2 %v1441_v35  ;;  %795 = vmatpush.msra.mxu3 %v467_v39 }
  0x56   : > { %396 = vmatpush.msra.mxu0 %v1402_v11  ;;  %482 = vmatpush.msra.mxu1 %v466_v41 }
  0x57   : > { %542 = vmatpush.msra.mxu2 %v1446_v38  ;;  %796 = vmatpush.msra.mxu3 %v466_v41 }
  0x58   : > { %397 = vmatpush.msra.mxu0 %v1405_v12  ;;  %483 = vmatpush.msra.mxu1 %v465_v43 }
  0x59   : > { %543 = vmatpush.msra.mxu2 %v1449_v40  ;;  %797 = vmatpush.msra.mxu3 %v465_v43 }
  0x5a   : > { %398 = vmatpush.msra.mxu0 %v1408_v13  ;;  %484 = vmatpush.msra.mxu1 %v464_v46 }
  0x5b   : > { %772 = vmatmul.msk.f32.vlgmr.msra.gmra.mxu0 %vm340_vm0, %v326_v14  ;;  %544 = vmatpush.msra.mxu2 %v1451_v42 }
  0x5c   : > { %798 = vmatpush.msra.mxu3 %v464_v46  ;;  %485 = vmatpush.msra.mxu1 %v463_v48 }
  0x5d   : > { %545 = vmatpush.msra.mxu2 %v446_v44 }
  0x5e   : > { %799 = vmatpush.msra.mxu3 %v463_v48  ;;  %486 = vmatpush.msra.mxu1 %v462_v50 }
  0x5f   : > { %546 = vmatpush.msra.mxu2 %v445_v47 }
  0x60   : > { %800 = vmatpush.msra.mxu3 %v462_v50  ;;  %487 = vmatpush.msra.mxu1 %v461_v52 }
  0x61   : > { %547 = vmatpush.msra.mxu2 %v444_v49 }
  0x62   : > { %488 = vmatpush.msra.mxu1 %v460_v55  ;;  %801 = vmatpush.msra.mxu3 %v461_v52 }
  0x63   : > { %773 = vmatmul.msk.f32.gmra.mxu0 %vm340_vm0, %v327_v15  ;;  %548 = vmatpush.msra.mxu2 %v443_v51 }
  0x64   : > { %489 = vmatpush.msra.mxu1 %v459_v56  ;;  %802 = vmatpush.msra.mxu3 %v460_v55 }
  0x65   : > { %549 = vmatpush.msra.mxu2 %v442_v53 }
  0x66   : > { %550 = vmatmul.f32.vlgmr.msra.gmra.mxu2 %v1408_v13  ;;  %490 = vmatpush.msra.mxu1 %v458_v57 }
  0x67   : > { %803 = vmatpush.msra.mxu3 %v459_v56 }
  0x69   : > { %804 = vmatpush.msra.mxu3 %v458_v57 }
  0x6b   : > { %774 = vmatmul.msk.f32.gmra.mxu0 %vm340_vm0, %v328_v16  ;;  %805 = vmatpush.msrb.mxu3 %v1420_v22  ;;  %v1486_v16 = vld [vmem:[%s1569_s3] ss:$0 sm:$0xff] }
  0x6d   : > { %806 = vmatpush.msrb.mxu3 %v1422_v23 }
  0x6e   : > { %553 = vmatmul.f32.gmra.mxu2 %v1405_v12 }
  0x6f   : > { %807 = vmatpush.msrb.mxu3 %v1425_v25 }
  0x71   : > { %808 = vmatpush.msrb.mxu3 %v1428_v26 }
  0x73   : > { %775 = vmatmul.msk.f32.gmra.mxu0 %vm340_vm0, %v329_v17  ;;  %809 = vmatpush.msrb.mxu3 %v1433_v29 }
  0x75   : > { %810 = vmatpush.msrb.mxu3 %v1436_v31 }
  0x76   : > { %556 = vmatmul.f32.gmra.mxu2 %v1402_v11 }
  0x77   : > { %811 = vmatpush.msrb.mxu3 %v1438_v33 }
  0x79   : > { %812 = vmatpush.msrb.mxu3 %v1441_v35 }
  0x7b   : > { %776 = vmatmul.msk.f32.gmra.mxu0 %vm340_vm0, %v330_v18  ;;  %813 = vmatpush.msrb.mxu3 %v1446_v38 }
  0x7d   : > { %814 = vmatpush.msrb.mxu3 %v1449_v40 }
  0x7e   : > { %559 = vmatmul.f32.gmra.mxu2 %v1399_v10 }
  0x7f   : > { %815 = vmatpush.msrb.mxu3 %v1451_v42 }
  0x81   : > { %816 = vmatpush.msrb.mxu3 %v446_v44 }
  0x83   : > { %777 = vmatmul.msk.f32.gmra.mxu0 %vm340_vm0, %v331_v19  ;;  %817 = vmatpush.msrb.mxu3 %v445_v47 }
  0x85   : > { %818 = vmatpush.msrb.mxu3 %v444_v49 }
  0x86   : > { %562 = vmatmul.f32.gmra.mxu2 %v1396_v9 }
  0x87   : > { %819 = vmatpush.msrb.mxu3 %v443_v51 }
  0x89   : > { %820 = vmatpush.msrb.mxu3 %v442_v53 }
  0x8b   : > { %778 = vmatmul.msk.f32.gmra.mxu0 %vm340_vm0, %v332_v20 }
  0x8e   : > { %565 = vmatmul.f32.gmra.mxu2 %v1393_v8 }
  0x93   : > { %779 = vmatmul.msk.f32.gmra.mxu0 %vm340_vm0, %v333_v21 }
  0x96   : > { %568 = vmatmul.f32.gmra.mxu2 %v1390_v7 }
  0x9b   : > { %780 = vmatmul.msk.f32.gmra.mxu0 %vm340_vm0, %v334_v27 }
  0x9e   : > { %571 = vmatmul.f32.gmra.mxu2 %v1387_v6 }
  0xa3   : > { %781 = vmatmul.msk.f32.gmra.mxu0 %vm340_vm0, %v335_v36 }
  0xa6   : > { %574 = vmatmul.f32.gmra.mxu2 %v1384_v5 }
  0xab   : > { %782 = vmatmul.msk.f32.gmra.mxu0 %vm340_vm0, %v336_v45 }
  0xae   : > { %577 = vmatmul.f32.gmra.mxu2 %v1381_v4 }
  0xb3   : > { %783 = vmatmul.msk.f32.gmra.mxu0 %vm340_vm0, %v337_v54 }
  0xb6   : > { %580 = vmatmul.f32.gmra.mxu2 %v1378_v3 }
  0xbb   : > { %784 = vmatmul.msk.f32.gmra.mxu0 %vm340_vm0, %v338_v58 }
  0xc3   : > { %785 = vmatmul.msk.f32.gmra.mxu0 %vm340_vm0, %v339_v59 }
  0xd8   : > { %v400_v60 = vpop.f32.mrf.mxu0 }
  0xd9   : > { %491 = vmatmul.f32.vlgmr.msra.gmra.mxu1 %v400_v60 }
  0xe0   : > { %v403_v61 = vpop.f32.mrf.mxu0 }
  0xe1   : > { %494 = vmatmul.f32.gmra.mxu1 %v403_v61 }
  0xe8   : > { %v406_v62 = vpop.f32.mrf.mxu0 }
  0xe9   : > { %497 = vmatmul.f32.gmra.mxu1 %v406_v62  ;;  %v551_v14 = vpop.f32.mrf.mxu2 }
  0xf0   : > { %v409_v63 = vpop.f32.mrf.mxu0 }
  0xf1   : > { %500 = vmatmul.f32.gmra.mxu1 %v409_v63  ;;  %v554_v3 = vpop.f32.mrf.mxu2 }
  0xf8   : > { %v412_v9 = vpop.f32.mrf.mxu0 }
  0xf9   : > { %503 = vmatmul.f32.gmra.mxu1 %v412_v9  ;;  %v557_v15 = vpop.f32.mrf.mxu2 }
 0x100   : > { %v415_v10 = vpop.f32.mrf.mxu0 }
 0x101   : > { %506 = vmatmul.f32.gmra.mxu1 %v415_v10 }
 0x108   : > { %v418_v8 = vpop.f32.mrf.mxu0 }
 0x109   : > { %509 = vmatmul.f32.gmra.mxu1 %v418_v8 }
 0x110   : > { %v421_v11 = vpop.f32.mrf.mxu0 }
 0x111   : > { %512 = vmatmul.f32.gmra.mxu1 %v421_v11 }
 0x118   : > { %v424_v7 = vpop.f32.mrf.mxu0 }
 0x119   : > { %515 = vmatmul.f32.gmra.mxu1 %v424_v7 }
 0x120   : > { %v427_v12 = vpop.f32.mrf.mxu0 }
 0x121   : > { %518 = vmatmul.f32.gmra.mxu1 %v427_v12 }
 0x128   : > { %v430_v6 = vpop.f32.mrf.mxu0 }
 0x129   : > { %521 = vmatmul.f32.gmra.mxu1 %v430_v6 }
 0x130   : > { %v433_v13 = vpop.f32.mrf.mxu0 }
 0x131   : > { %524 = vmatmul.f32.vlgmr.msra.gmra.mxu3 %v433_v13 }
 0x138   : > { %v436_v5 = vpop.f32.mrf.mxu0 }
 0x139   : > { %527 = vmatmul.f32.gmra.mxu3 %v436_v5 }
 0x140   : > { %v439_v4 = vpop.f32.mrf.mxu0 }
 0x141   : > { %530 = vmatmul.f32.gmra.mxu3 %v439_v4 }
 0x149   : > { %583 = vmatmul.f32.vlgmr.msrb.gmra.mxu3 %v1375_v2  ;;  %v560_v2 = vpop.f32.mrf.mxu2 }
 0x151   : > { %586 = vmatmul.f32.gmra.mxu3 %v1372_v1  ;;  %v563_v24 = vpop.f32.mrf.mxu2 }
 0x156   : > { %v492_v17 = vpop.f32.mrf.mxu1 }
 0x157   : > { %v552_v18 = vadd.f32 %v551_v14, %v492_v17 }
 0x159   : > { %v596_v19 = vadd.f32 %v1486_v16, %v552_v18  ;;  %589 = vmatmul.f32.gmra.mxu3 %v1370_v0  ;;  %v566_v28 = vpop.f32.mrf.mxu2 }
 0x15b   : > { %610 = vst [vmem:[%s1492_s7] sm:$0xff] %v596_v19 }
 0x15e   : > { %v495_v1 = vpop.f32.mrf.mxu1 }
 0x15f   : > { %v555_v20 = vadd.f32 %v554_v3, %v495_v1 }
 0x161   : > { %v597_v21 = vadd.f32 %v1486_v16, %v555_v20  ;;  %v569_v32 = vpop.f32.mrf.mxu2 }
 0x163   : > { %611 = vst [vmem:[%s1492_s7 + $0x8] sm:$0xff] %v597_v21 }
 0x166   : > { %v498_v22 = vpop.f32.mrf.mxu1 }
 0x167   : > { %v558_v23 = vadd.f32 %v557_v15, %v498_v22 }
 0x169   : > { %v598_v0 = vadd.f32 %v1486_v16, %v558_v23  ;;  %v572_v37 = vpop.f32.mrf.mxu2 }
 0x16b   : > { %612 = vst [vmem:[%s1492_s7 + $0x10] sm:$0xff] %v598_v0 }
 0x16e   : > { %v501_v25 = vpop.f32.mrf.mxu1 }
 0x16f   : > { %v561_v26 = vadd.f32 %v560_v2, %v501_v25 }
 0x171   : > { %v599_v27 = vadd.f32 %v1486_v16, %v561_v26  ;;  %v575_v42 = vpop.f32.mrf.mxu2 }
 0x173   : > { %613 = vst [vmem:[%s1492_s7 + $0x18] sm:$0xff] %v599_v27 }
 0x176   : > { %v504_v29 = vpop.f32.mrf.mxu1 }
 0x177   : > { %v564_v30 = vadd.f32 %v563_v24, %v504_v29 }
 0x179   : > { %v600_v31 = vadd.f32 %v1486_v16, %v564_v30  ;;  %v578_v47 = vpop.f32.mrf.mxu2 }
 0x17b   : > { %614 = vst [vmem:[%s1492_s7 + $0x20] sm:$0xff] %v600_v31 }
 0x17e   : > { %v507_v33 = vpop.f32.mrf.mxu1 }
 0x17f   : > { %v567_v34 = vadd.f32 %v566_v28, %v507_v33 }
 0x181   : > { %v601_v35 = vadd.f32 %v1486_v16, %v567_v34  ;;  %v581_v51 = vpop.f32.mrf.mxu2 }
 0x183   : > { %615 = vst [vmem:[%s1492_s7 + $0x28] sm:$0xff] %v601_v35 }
 0x186   : > { %v510_v36 = vpop.f32.mrf.mxu1 }
 0x187   : > { %v570_v38 = vadd.f32 %v569_v32, %v510_v36 }
 0x189   : > { %v602_v39 = vadd.f32 %v1486_v16, %v570_v38 }
 0x18b   : > { %616 = vst [vmem:[%s1492_s7 + $0x30] sm:$0xff] %v602_v39 }
 0x18e   : > { %v513_v40 = vpop.f32.mrf.mxu1 }
 0x18f   : > { %v573_v41 = vadd.f32 %v572_v37, %v513_v40 }
 0x191   : > { %v603_v43 = vadd.f32 %v1486_v16, %v573_v41 }
 0x193   : > { %617 = vst [vmem:[%s1492_s7 + $0x38] sm:$0xff] %v603_v43 }
 0x196   : > { %v516_v44 = vpop.f32.mrf.mxu1 }
 0x197   : > { %v576_v45 = vadd.f32 %v575_v42, %v516_v44 }
 0x199   : > { %v604_v46 = vadd.f32 %v1486_v16, %v576_v45 }
 0x19b   : > { %618 = vst [vmem:[%s1492_s7 + $0x40] sm:$0xff] %v604_v46 }
 0x19e   : > { %v519_v48 = vpop.f32.mrf.mxu1 }
 0x19f   : > { %v579_v49 = vadd.f32 %v578_v47, %v519_v48 }
 0x1a1   : > { %v605_v50 = vadd.f32 %v1486_v16, %v579_v49 }
 0x1a3   : > { %619 = vst [vmem:[%s1492_s7 + $0x48] sm:$0xff] %v605_v50 }
 0x1a6   : > { %v522_v52 = vpop.f32.mrf.mxu1 }
 0x1a7   : > { %v582_v53 = vadd.f32 %v581_v51, %v522_v52 }
 0x1a9   : > { %v606_v54 = vadd.f32 %v1486_v16, %v582_v53 }
 0x1ab   : > { %620 = vst [vmem:[%s1492_s7 + $0x50] sm:$0xff] %v606_v54 }
 0x1b4   : > { %v525_v55 = vpop.f32.mrf.mxu3 }
 0x1bc   : > { %v528_v56 = vpop.f32.mrf.mxu3 }
 0x1c4   : > { %v531_v57 = vpop.f32.mrf.mxu3 }
 0x1cc   : > { %v584_v58 = vpop.f32.mrf.mxu3 }
 0x1cd   : > { %v585_v59 = vadd.f32 %v584_v58, %v525_v55 }
 0x1cf   : > { %v607_v60 = vadd.f32 %v1486_v16, %v585_v59 }
 0x1d1   : > { %621 = vst [vmem:[%s1492_s7 + $0x58] sm:$0xff] %v607_v60 }
 0x1d4   : > { %v587_v61 = vpop.f32.mrf.mxu3 }
 0x1d5   : > { %v588_v62 = vadd.f32 %v587_v61, %v528_v56 }
 0x1d7   : > { %v608_v63 = vadd.f32 %v1486_v16, %v588_v62 }
 0x1d9   : > { %622 = vst [vmem:[%s1492_s7 + $0x60] sm:$0xff] %v608_v63 }
 0x1dc   : > { %v590_v9 = vpop.f32.mrf.mxu3 }
 0x1dd   : > { %v591_v10 = vadd.f32 %v590_v9, %v531_v57 }
 0x1df   : > { %v609_v8 = vadd.f32 %v1486_v16, %v591_v10 }
 0x1e1   : > { %623 = vst [vmem:[%s1492_s7 + $0x68] sm:$0xff] %v609_v8 }
 0x1e2   : > { %1088 = shalt.err (!%p1085_p13)
}
 0x1e3   : > { %s1175_s0 = smov 128   ;;  %s1176_s6 = smov 256  }
 0x1e4   : > { %s1177_s28 = smov 8  }
 0x1e5   : > { %839 = dma.vmem_to_hbm [thread:$0]  (%p1321_p3), %s639_s9, 1792, %s641_s12, %s625_s21, %s1175_s0, %s1176_s6, %s1177_s28  }
 0x1e6 PF: > { %s1602_s30 = sld [smem:[#allocation15_spill]]  ;;  %p866_p0 = scmp.ge.s32.totalorder %s1167_s25, 2 }
 0x1e8   : > { %p856_p5 = pnand %p866_p0, %p1267_p6 }
 0x1ea   : > { %p857_p7 = pneg %p856_p5 }
 0x1ec   : > { %s655_s14 = sand.u32 1, %s1602_s30  }
 0x1ed   : > { %s656_s16 = scalar_lea.sflag [#allocation4], %s655_s14 }
 0x1ee   : > { %1134 = dma.done.wait (%p857_p7), %s656_s16, 1792  }
 0x1ef   : > { %1136 = vsyncadd (%p857_p7), %s656_s16, 4294965504  ;;  %s23_s25 = sadd.s32 1, %s1167_s25   ;;  %s1604_s17 = sld [smem:[#allocation17_spill]] }
 0x1f0   : > { %p20_p9 = scmp.ge.s32.totalorder %s23_s25, 6   ;;  %s1605_s27 = sld [smem:[#allocation19_spill]] }
 0x1f1   : > { %s1606_s18 = smov %s1143_s19  ;;  %s1607_s19 = smov %s1147_s20 }
 0x1f2   : > { %s1608_s20 = smov %s1338_s15  ;;  %s1609_s21 = smov %s1159_s23 }
 0x1f3   : > { %s1610_s22 = smov %s1163_s24  ;;  %22 = sbr.rel (!%p20_p9) target bundleno = 13 (0xd), region = 98 }
 0x1f5   : > { %s1611_s23 = smov %s1604_s17 }
 0x1f6   : > { %s1612_s24 = smov %s1605_s27 }
 0x1f8   :  { %662 = vsyncpa [#allocation3], 1 }
 0x1f9   :  { %664 = vsyncpa [#allocation3 + $0x1], 1 }
 0x1fa   :  { %665 = vsyncpa [#allocation6], 1 }
 0x1fb   :  { %666 = vsyncpa [#allocation9], 1 }
 0x1fc   :  { %668 = vsyncpa [#allocation9 + $0x1], 1 }
 0x1fd   :  { %669 = vsyncpa [#allocation4], 1 }
 0x1fe   :  { %671 = vsyncpa [#allocation4 + $0x1], 1 }

</bundles_post_ra>
